<compile_context>
chip_gen: v7x
topology: tpu7x:2x2x1
jax: 0.10.0
libtpu: 0.0.40
codegen_flags: <defaults>
</compile_context>

<pallas_src>
import functools

import jax
import jax.numpy as jnp
from jax.experimental import pallas as pl
from jax.experimental.pallas import tpu as pltpu


# ---------------------------------------------------------------------------
# Fused fast path
# ---------------------------------------------------------------------------
def _se_fused_kernel(x_ref, w1t_ref, b1_ref, w2t_ref, b2_ref, o_ref, *, inv_hw):
    # x block: (nb, C, HW) — channels on sublanes, spatial on lanes (unpadded).
    x = x_ref[...]

    # squeeze: global mean over spatial lanes (f32 accumulation).
    mean = jnp.sum(x.astype(jnp.float32), axis=-1) * inv_hw               # (nb, C)

    # excitation: two tiny MXU matmuls (1x1 convs over channels), ReLU + sigmoid.
    h = jnp.dot(mean, w1t_ref[...], preferred_element_type=jnp.float32)
    h = jnp.maximum(h + b1_ref[...], 0.0)                                 # (nb, Cr)
    y = jnp.dot(h, w2t_ref[...], preferred_element_type=jnp.float32)
    gate = jax.nn.sigmoid(y + b2_ref[...])                                # (nb, C) f32

    # scale: multiply in f32, cast once on store.
    o_ref[...] = (x.astype(jnp.float32) * gate[:, :, None]).astype(o_ref.dtype)


# ---------------------------------------------------------------------------
# Fallback path (large per-batch feature maps): gate kernel + scale kernel
# ---------------------------------------------------------------------------
def _se_gate_kernel(x_ref, w1t_ref, b1_ref, w2t_ref, b2_ref, gate_ref, sum_ref,
                    *, hw, hw_tile, need_mask):
    hwi = pl.program_id(1)

    @pl.when(hwi == 0)
    def _():
        sum_ref[...] = jnp.zeros_like(sum_ref)

    x = x_ref[...].astype(jnp.float32)                       # (1, C, hw_tile)
    if need_mask:  # last tile is partial: zero the out-of-range lanes
        pos = hwi * hw_tile + jax.lax.broadcasted_iota(jnp.int32, x.shape, 2)
        x = jnp.where(pos < hw, x, 0.0)
    sum_ref[...] += jnp.sum(x, axis=-1)                      # (1, C)

    @pl.when(hwi == pl.num_programs(1) - 1)
    def _():
        mean = sum_ref[...] * (1.0 / float(hw))
        h = jnp.dot(mean, w1t_ref[...], preferred_element_type=jnp.float32)
        h = jnp.maximum(h + b1_ref[...], 0.0)
        y = jnp.dot(h, w2t_ref[...], preferred_element_type=jnp.float32)
        # gate stored channel-on-sublane so the scale kernel broadcasts over lanes.
        gate_ref[...] = jax.nn.sigmoid(y + b2_ref[...])[:, :, None]      # (1, C, 1)


def _se_scale_kernel(x_ref, gate_ref, o_ref):
    x = x_ref[...].astype(jnp.float32)
    o_ref[...] = (x * gate_ref[...]).astype(o_ref.dtype)    # (1,C,1) broadcasts over lanes


# ---------------------------------------------------------------------------
# Hardware probing / sizing helpers
# ---------------------------------------------------------------------------
def _tpu_vmem_bytes():
    try:
        return int(pltpu.get_tpu_info().vmem_capacity_bytes)
    except Exception:
        return 64 << 20          # conservative (v7x per-TensorCore VMEM)


def _num_tensorcores():
    try:
        kind = jax.devices()[0].device_kind.lower()
    except Exception:
        return 2
    if any(t in kind for t in ("lite", "v5e", "v6e", "v6")):
        return 1                 # v5e / v6e: single TensorCore per chip
    return 2                     # v4 / v5p megacore, v7x dual-TC, unknown future


def _largest_divisor_leq(n, cap):
    cap = max(1, min(int(cap), n))
    for d in range(cap, 0, -1):
        if n % d == 0:
            return d
    return 1


# ---------------------------------------------------------------------------
# Wrapper
# ---------------------------------------------------------------------------
def se_block(x_nchw, w1, b1, w2, b2, *, target_block_bytes=12 << 20,
             donate_x=False):
    """x_nchw: (N, C, H, W). w1: (Cr, C), b1: (Cr,), w2: (C, Cr), b2: (C,)."""
    N, C, H, W = x_nchw.shape
    Cr = w1.shape[0]
    HW = H * W
    itemsize = x_nchw.dtype.itemsize

    # No padding, no extra copies: reshape only (free at the XLA level).
    x = x_nchw.reshape(N, C, HW)

    # Pre-transposed weights -> straight matmuls in-kernel; biases as rows.
    w1t = w1.T.astype(jnp.float32)                 # (C, Cr)
    w2t = w2.T.astype(jnp.float32)                 # (Cr, C)
    b1_row = b1.reshape(1, Cr).astype(jnp.float32)
    b2_row = b2.reshape(1, C).astype(jnp.float32)
    weight_bytes = (w1t.size + w2t.size + b1_row.size + b2_row.size) * 4

    vmem_cap = _tpu_vmem_bytes()
    num_tc = _num_tensorcores()

    # Block budget: 2 double-buffered (input + output) blocks + resident weights
    # must fit comfortably inside physical VMEM (generation-aware).
    slack = 2 << 20
    block_budget = min(
        int(target_block_bytes),
        max(1 << 20, (int(0.8 * vmem_cap) - weight_bytes - slack) // 4),
    )

    # VMEM footprint uses padded tile dims (8 sublanes x 128 lanes).
    hw_pad = pl.cdiv(HW, 128) * 128
    c_pad = pl.cdiv(C, 8) * 8
    per_batch_vmem = c_pad * hw_pad * itemsize

    if per_batch_vmem <= block_budget:
        # ---------------- fused fast path ----------------
        ideal_nb = max(1, block_budget // per_batch_vmem)
        if num_tc > 1 and N > 1:
            # keep >= num_tc grid steps so every TensorCore gets work
            ideal_nb = min(ideal_nb, max(1, N // num_tc))
        nb = _largest_divisor_leq(N, ideal_nb)
        grid = (N // nb,)
        # TODO(synk): when N < num_tc on dual-TC chips (v7x) the fused op runs on
        # one TensorCore; parallelizing the squeeze over HW tiles (partial sums)
        # would feed both cores for single-image inference.

        block_vmem = nb * per_batch_vmem
        needed = 4 * block_vmem + weight_bytes + slack   # 2 bufs x (in + out)
        vmem_limit = int(min(0.9 * vmem_cap, max(needed, 16 << 20)))

        cost = pl.CostEstimate(
            flops=2 * N * C * HW + 4 * N * C * Cr,
            transcendentals=N * C,
            bytes_accessed=2 * N * C * HW * itemsize + weight_bytes,
        )

        kernel = functools.partial(_se_fused_kernel, inv_hw=1.0 / float(HW))
        out = pl.pallas_call(
            kernel,
            out_shape=jax.ShapeDtypeStruct((N, C, HW), x.dtype),
            grid_spec=pltpu.PrefetchScalarGridSpec(
                num_scalar_prefetch=0,
                grid=grid,
                in_specs=[
                    pl.BlockSpec((nb, C, HW), lambda n: (n, 0, 0)),  # x
                    pl.BlockSpec((C, Cr), lambda n: (0, 0)),         # w1^T (resident)
                    pl.BlockSpec((1, Cr), lambda n: (0, 0)),         # b1
                    pl.BlockSpec((Cr, C), lambda n: (0, 0)),         # w2^T
                    pl.BlockSpec((1, C), lambda n: (0, 0)),          # b2
                ],
                out_specs=pl.BlockSpec((nb, C, HW), lambda n: (n, 0, 0)),
            ),
            compiler_params=pltpu.CompilerParams(
                dimension_semantics=("parallel",),
                vmem_limit_bytes=vmem_limit,
            ),
            cost_estimate=cost,
            input_output_aliases=({0: 0} if donate_x else {}),
        )(x, w1t, b1_row, w2t, b2_row)
        return out.reshape(N, C, H, W)

    # ---------------- fallback: HW-tiled two-kernel path ----------------
    # (one batch element does not fit a VMEM block -> gate pass + scale pass)
    hw_tile = max(128, (block_budget // (c_pad * itemsize)) // 128 * 128)
    hw_tile = min(hw_tile, hw_pad)
    n_hw = pl.cdiv(HW, hw_tile)
    need_mask = (HW % hw_tile) != 0
    block_vmem = c_pad * hw_tile * itemsize

    gate_kernel = functools.partial(_se_gate_kernel, hw=HW, hw_tile=hw_tile,
                                    need_mask=need_mask)
    gate_vmem = int(min(0.9 * vmem_cap,
                        max(2 * block_vmem + weight_bytes + (4 << 20), 16 << 20)))
    gate = pl.pallas_call(
        gate_kernel,
        out_shape=jax.ShapeDtypeStruct((N, C, 1), jnp.float32),
        grid_spec=pltpu.PrefetchScalarGridSpec(
            num_scalar_prefetch=0,
            grid=(N, n_hw),
            in_specs=[
                pl.BlockSpec((1, C, hw_tile), lambda n, h: (n, 0, h)),
                pl.BlockSpec((C, Cr), lambda n, h: (0, 0)),
                pl.BlockSpec((1, Cr), lambda n, h: (0, 0)),
                pl.BlockSpec((Cr, C), lambda n, h: (0, 0)),
                pl.BlockSpec((1, C), lambda n, h: (0, 0)),
            ],
            out_specs=pl.BlockSpec((1, C, 1), lambda n, h: (n, 0, 0)),
            scratch_shapes=[pltpu.VMEM((1, C), jnp.float32)],
        ),
        compiler_params=pltpu.CompilerParams(
            dimension_semantics=("parallel", "arbitrary"),
            vmem_limit_bytes=gate_vmem,
        ),
        cost_estimate=pl.CostEstimate(
            flops=N * C * HW + 4 * N * C * Cr,
            transcendentals=N * C,
            bytes_accessed=N * C * HW * itemsize + weight_bytes,
        ),
    )(x, w1t, b1_row, w2t, b2_row)

    scale_vmem = int(min(0.9 * vmem_cap, max(4 * block_vmem + (4 << 20), 16 << 20)))
    out = pl.pallas_call(
        _se_scale_kernel,
        out_shape=jax.ShapeDtypeStruct((N, C, HW), x.dtype),
        grid_spec=pltpu.PrefetchScalarGridSpec(
            num_scalar_prefetch=0,
            grid=(N, n_hw),
            in_specs=[
                pl.BlockSpec((1, C, hw_tile), lambda n, h: (n, 0, h)),
                pl.BlockSpec((1, C, 1), lambda n, h: (n, 0, 0)),
            ],
            out_specs=pl.BlockSpec((1, C, hw_tile), lambda n, h: (n, 0, h)),
        ),
        compiler_params=pltpu.CompilerParams(
            dimension_semantics=("parallel", "parallel"),
            vmem_limit_bytes=scale_vmem,
        ),
        cost_estimate=pl.CostEstimate(
            flops=N * C * HW,
            transcendentals=0,
            bytes_accessed=2 * N * C * HW * itemsize + N * C * 4,
        ),
    )(x, gate)
    return out.reshape(N, C, H, W)


def se_block_ref(x_nchw, w1, b1, w2, b2):
    """Pure-JAX reference matching PyTorch SEBlock.forward."""
    y = jnp.mean(x_nchw, axis=(2, 3))                         # (N, C)
    h = jnp.maximum(y @ w1.T + b1, 0.0)                       # (N, Cr)
    g = jax.nn.sigmoid(h @ w2.T + b2)                         # (N, C)
    return x_nchw * g[:, :, None, None]


if __name__ == "__main__":
    key = jax.random.PRNGKey(0)
    kx, k1, k2, k3, k4, kx2 = jax.random.split(key, 6)

    # planes=16, reduction=8 -> hidden=2
    C, reduction = 16, 8
    Cr = C // reduction
    w1 = jax.random.normal(k1, (Cr, C), dtype=jnp.float32) * 0.1
    b1 = jax.random.normal(k2, (Cr,), dtype=jnp.float32) * 0.1
    w2 = jax.random.normal(k3, (C, Cr), dtype=jnp.float32) * 0.1
    b2 = jax.random.normal(k4, (C,), dtype=jnp.float32) * 0.1

    # 1) fused fast path, HW a multiple of 128
    x0 = jax.random.normal(kx, (2, C, 16, 16), dtype=jnp.float32)
    out0 = jax.block_until_ready(se_block(x0, w1, b1, w2, b2))
    ref0 = se_block_ref(x0, w1, b1, w2, b2)
    assert jnp.allclose(out0, ref0, atol=1e-5, rtol=1e-5), "fused (aligned) mismatch"

    # 2) fused fast path, HW NOT a multiple of 128 (no pad / no output slice)
    x1 = jax.random.normal(kx2, (2, C, 14, 14), dtype=jnp.float32)
    out1 = jax.block_until_ready(se_block(x1, w1, b1, w2, b2))
    ref1 = se_block_ref(x1, w1, b1, w2, b2)
    assert jnp.allclose(out1, ref1, atol=1e-5, rtol=1e-5), "fused (ragged) mismatch"

    # 3) HW-tiled fallback path (forced via a tiny block budget), partial last
    #    lane tile exercises the reduction mask.
    out2 = jax.block_until_ready(
        se_block(x1, w1, b1, w2, b2, target_block_bytes=4 * C * 128))
    assert jnp.allclose(out2, ref1, atol=1e-5, rtol=1e-5), "tiled fallback mismatch"

    # 4) aliased (donated-x) fast path
    f = jax.jit(lambda xx: se_block(xx, w1, b1, w2, b2, donate_x=True),
                donate_argnums=0)
    out3 = jax.block_until_ready(f(jnp.array(x0)))
    assert jnp.allclose(out3, ref0, atol=1e-5, rtol=1e-5), "aliased path mismatch"

    print("KERNEL_OK")
</pallas_src>

<mosaic_0001>
module attributes {stable_mosaic.version = 11 : i64} {
  func.func @_se_fused_kernel(%arg0: i32, %arg1: memref<1x16x256xf32, #tpu.memory_space<vmem>>, %arg2: memref<16x2xf32, #tpu.memory_space<vmem>>, %arg3: memref<1x2xf32, #tpu.memory_space<vmem>>, %arg4: memref<2x16xf32, #tpu.memory_space<vmem>>, %arg5: memref<1x16xf32, #tpu.memory_space<vmem>>, %arg6: memref<1x16x256xf32, #tpu.memory_space<vmem>>) attributes {dimension_semantics = [#tpu.dimension_semantics<parallel>], iteration_bounds = array<i64: 2>, scalar_prefetch = 0 : i64, scratch_operands = 0 : i64, tpu.core_type = #tpu.core_type<tc>, window_params = [{transform_indices = @transform_0, window_bounds = array<i64: 1, 16, 256>}, {pipeline_mode = #tpu.pipeline_mode<synchronous>, transform_indices = @transform_1, window_bounds = array<i64: 16, 2>}, {pipeline_mode = #tpu.pipeline_mode<synchronous>, transform_indices = @transform_2, window_bounds = array<i64: 1, 2>}, {pipeline_mode = #tpu.pipeline_mode<synchronous>, transform_indices = @transform_3, window_bounds = array<i64: 2, 16>}, {pipeline_mode = #tpu.pipeline_mode<synchronous>, transform_indices = @transform_4, window_bounds = array<i64: 1, 16>}, {transform_indices = @transform_5, window_bounds = array<i64: 1, 16, 256>}]} {
    %c0 = arith.constant 0 : index
    %c0_0 = arith.constant 0 : index
    %c0_1 = arith.constant 0 : index
    %0 = vector.load %arg1[%c0, %c0_0, %c0_1] : memref<1x16x256xf32, #tpu.memory_space<vmem>>, vector<1x16x256xf32>
    %cst = arith.constant dense<0.000000e+00> : vector<1x16xf32>
    %1 = vector.multi_reduction <add>, %0, %cst [2] : vector<1x16x256xf32> to vector<1x16xf32>
    %cst_2 = arith.constant 3.906250e-03 : f32
    %2 = vector.broadcast %cst_2 : f32 to vector<1x16xf32>
    %3 = arith.mulf %1, %2 : vector<1x16xf32>
    %c0_3 = arith.constant 0 : index
    %c0_4 = arith.constant 0 : index
    %4 = vector.load %arg2[%c0_3, %c0_4] : memref<16x2xf32, #tpu.memory_space<vmem>>, vector<16x2xf32>
    %cst_5 = arith.constant dense<0.000000e+00> : vector<1x2xf32>
    %5 = tpu.matmul %3, %4, %cst_5 {dimension_numbers = #tpu.dot_dimension_numbers<[1], [0], [0], [1], [0, 0, 1, 1], [], []>} : vector<1x16xf32>, vector<16x2xf32>, vector<1x2xf32> -> vector<1x2xf32>
    %c0_6 = arith.constant 0 : index
    %c0_7 = arith.constant 0 : index
    %6 = vector.load %arg3[%c0_6, %c0_7] : memref<1x2xf32, #tpu.memory_space<vmem>>, vector<1x2xf32>
    %7 = arith.addf %5, %6 : vector<1x2xf32>
    %cst_8 = arith.constant 0.000000e+00 : f32
    %8 = vector.broadcast %cst_8 : f32 to vector<1x2xf32>
    %9 = arith.maximumf %7, %8 : vector<1x2xf32>
    %c0_9 = arith.constant 0 : index
    %c0_10 = arith.constant 0 : index
    %10 = vector.load %arg4[%c0_9, %c0_10] : memref<2x16xf32, #tpu.memory_space<vmem>>, vector<2x16xf32>
    %cst_11 = arith.constant dense<0.000000e+00> : vector<1x16xf32>
    %11 = tpu.matmul %9, %10, %cst_11 {dimension_numbers = #tpu.dot_dimension_numbers<[1], [0], [0], [1], [0, 0, 1, 1], [], []>} : vector<1x2xf32>, vector<2x16xf32>, vector<1x16xf32> -> vector<1x16xf32>
    %c0_12 = arith.constant 0 : index
    %c0_13 = arith.constant 0 : index
    %12 = vector.load %arg5[%c0_12, %c0_13] : memref<1x16xf32, #tpu.memory_space<vmem>>, vector<1x16xf32>
    %13 = arith.addf %11, %12 : vector<1x16xf32>
    %14 = arith.negf %13 : vector<1x16xf32>
    %15 = math.exp %14 : vector<1x16xf32>
    %cst_14 = arith.constant 1.000000e+00 : f32
    %16 = vector.broadcast %cst_14 : f32 to vector<1x16xf32>
    %17 = arith.addf %16, %15 : vector<1x16xf32>
    %18 = arith.divf %16, %17 : vector<1x16xf32>
    %19 = vector.shape_cast %18 : vector<1x16xf32> to vector<1x16x1xf32>
    %20 = vector.broadcast %19 : vector<1x16x1xf32> to vector<1x16x256xf32>
    %21 = arith.mulf %0, %20 : vector<1x16x256xf32>
    %c0_15 = arith.constant 0 : index
    %c0_16 = arith.constant 0 : index
    %c0_17 = arith.constant 0 : index
    %22 = vector.load %arg6[%c0_15, %c0_16, %c0_17] : memref<1x16x256xf32, #tpu.memory_space<vmem>>, vector<1x16x256xf32>
    tpu.vector_store %arg6[%c0_15, %c0_16, %c0_17], %21 {strides = array<i32>} : memref<1x16x256xf32, #tpu.memory_space<vmem>>, vector<1x16x256xf32>,
    return
  }
  func.func @transform_0(%arg0: i32) -> (i32, i32, i32) {
    %c0_i32 = arith.constant 0 : i32
    %c0_i32_0 = arith.constant 0 : i32
    %c0_i32_1 = arith.constant 0 : i32
    return %arg0, %c0_i32, %c0_i32_0 : i32, i32, i32
  }
  func.func @transform_1(%arg0: i32) -> (i32, i32) {
    %c0_i32 = arith.constant 0 : i32
    %c0_i32_0 = arith.constant 0 : i32
    %c0_i32_1 = arith.constant 0 : i32
    return %c0_i32, %c0_i32_0 : i32, i32
  }
  func.func @transform_2(%arg0: i32) -> (i32, i32) {
    %c0_i32 = arith.constant 0 : i32
    %c0_i32_0 = arith.constant 0 : i32
    %c0_i32_1 = arith.constant 0 : i32
    return %c0_i32, %c0_i32_0 : i32, i32
  }
  func.func @transform_3(%arg0: i32) -> (i32, i32) {
    %c0_i32 = arith.constant 0 : i32
    %c0_i32_0 = arith.constant 0 : i32
    %c0_i32_1 = arith.constant 0 : i32
    return %c0_i32, %c0_i32_0 : i32, i32
  }
  func.func @transform_4(%arg0: i32) -> (i32, i32) {
    %c0_i32 = arith.constant 0 : i32
    %c0_i32_0 = arith.constant 0 : i32
    %c0_i32_1 = arith.constant 0 : i32
    return %c0_i32, %c0_i32_0 : i32, i32
  }
  func.func @transform_5(%arg0: i32) -> (i32, i32, i32) {
    %c0_i32 = arith.constant 0 : i32
    %c0_i32_0 = arith.constant 0 : i32
    %c0_i32_1 = arith.constant 0 : i32
    return %arg0, %c0_i32, %c0_i32_0 : i32, i32, i32
  }
}

</mosaic_0001>

<bundles_post_ra>
// kernel: tpu_custom_call.1
= control target key start
LH: loop header
LB: loop body
LE: loop exit
PB: predicated region body
PF: predicated region fallthrough
CT: control target
= control target key end

     0   :  { %10 = vsyncpa [#allocation3], 0  ;;  %s962_s0 = inlined_call_operand.hbm [shape: f32[2,16,256], index: 0, kind: input, shape index: {}]   ;;  %s963_s1 = inlined_call_operand.vmem [shape: f32[16,2], index: 1, kind: input, shape index: {}]   ;;  %s964_s2 = inlined_call_operand.vmem [shape: f32[1,2], index: 2, kind: input, shape index: {}]   ;;  %s965_s3 = inlined_call_operand.vmem [shape: f32[2,16], index: 3, kind: input, shape index: {}]   ;;  %s966_s4 = inlined_call_operand.vmem [shape: f32[1,16], index: 4, kind: input, shape index: {}]   ;;  %s967_s5 = inlined_call_operand.hbm [shape: f32[2,16,256], index: 5, kind: output, shape index: {}]  }
   0x1   :  { %12 = vsyncpa [#allocation3 + $0x1], 0 }
   0x2   :  { %13 = vsyncpa [#allocation4], 0 }
   0x3   :  { %15 = vsyncpa [#allocation4 + $0x1], 0  ;;  %s773_s18 = smov 0   ;;  %s775_s19 = smov 0  }
   0x4   :  { %s777_s20 = smov 0   ;;  %s779_s21 = smov 0  }
   0x5 LB: > { %s794_s22 = sadd.s32 4294967295, %s732_s21   ;;  %s539_s23 = sadd.s32 4294967294, %s732_s21   ;;  %s732_s21 = sphi %s779_s21, %s980_s21   ;;  %s728_s20 = sphi %s777_s20, %s979_s20   ;;  %s724_s19 = sphi %s775_s19, %s978_s19   ;;  %s720_s18 = sphi %s773_s18, %s977_s18  }
   0x6   : > { %s798_s24 = sadd.s32 1, %s732_s21   ;;  %s28_s25 = sadd.s32 1, %s728_s20 }
   0x7   : > { %s25_s26 = ssub.s32 %s732_s21, %s798_s24  ;;  %p35_p0 = scmp.ne.s32.totalorder %s728_s20, %s724_s19 }
   0x8   : > { %p26_p1 = scmp.eq.s32.totalorder %s25_s26, 0  ;;  %p36_p2 = scmp.eq.s32.totalorder %s732_s21, 0 }
   0x9   : > { %p41_p3 = scmp.ne.s32.totalorder %s724_s19, %s720_s18  ;;  %p42_p4 = scmp.eq.s32.totalorder %s794_s22, 0 }
   0xa   : > { %s810_s27 = scalar_select %p26_p1, %s728_s20, %s28_s25  }
   0xb   : > { %p812_p5 = por %p36_p2, %p35_p0  ;;  %p816_p6 = por %p42_p4, %p41_p3 }
   0xc   : > { %p149_p7 = scmp.eq.s32.totalorder %s794_s22, 1  ;;  %p155_p8 = scmp.eq.s32.totalorder %s539_s23, 1 }
   0xd   : > { %p591_p10 = scmp.lt.s32.totalorder %s732_s21, 2  ;;  %s187_s7 = sand.u32 1, %s728_s20  }
   0xe   : > { %p823_p11 = por %p149_p7, %p35_p0  ;;  %p827_p12 = por %p155_p8, %p41_p3 }
   0xf   : > { %s557_s8 = sshll.u32 %s732_s21, 9  ;;  %s542_s9 = sshll.u32 %s187_s7, 5 }
  0x10   : > { %s971_s30 = scalar_select %p823_p11, 1, 0 }
  0x11   : > { %s972_s6 = scalar_select %p827_p12, 1, 0 }
  0x12   : > { %s836_s12 = scalar_lea.hbm %s962_s0, %s557_s8  ;;  %s191_s13 = scalar_lea.vmem [#allocation2], %s542_s9 }
  0x13   : > { %s198_s14 = sshll.u32 %s191_s13, 4  ;;  %p840_p13 = pnand %p591_p10, %p812_p5  ;;  %s844_s14 = int_to_ptr.vmem [resolvable:$true] %s198_s14 }
  0x14   : > { %s846_s16 = scalar_lea.sflag [#allocation3], %s187_s7  ;;  %s636_s17 = scalar_lea.hbm %s836_s12, 512 }
  0x15   : > { %p637_p0 = scmp.ne.s32.totalorder %s836_s12, %s636_s17  ;;  %p638_p1 = pneg %p840_p13 }
  0x16   : > { %s641_s26 = scalar_lea.hbm %s962_s0, 1024  ;;  %p642_p4 = scmp.lt.u32.totalorder %s836_s12, %s962_s0 }
  0x17   : > { %p639_p2 = pnand %p638_p1, %p637_p0  ;;  %p643_p5 = scmp.lt.u32.totalorder %s641_s26, %s636_s17 }
  0x18   : > { %p645_p8 = scmp.lt.u32.totalorder %s636_s17, %s836_s12 }
  0x19   : > { %p640_p3 = pneg %p639_p2  ;;  %p644_p7 = por %p643_p5, %p642_p4 }
  0x1b   : > { %p646_p10 = por %p645_p8, %p644_p7 }
  0x1d   : > { %p647_p9 = pnand %p646_p10, %p640_p3 }
  0x1f   : > { %650 = shalt.err (!%p647_p9)
}
  0x20   : > { %s651_s7 = scalar_lea.vmem %s844_s14, 512  ;;  %s734_s9 = smov [#allocation2]  }
  0x21   : > { %p652_p0 = scmp.ne.s32.totalorder %s844_s14, %s651_s7  ;;  %s656_s10 = sshll.u32 %s734_s9, 4  ;;  %s657_s10 = int_to_ptr.vmem [resolvable:$false] %s656_s10 }
  0x22   : > { %s658_s11 = scalar_lea.vmem %s657_s10, 1024  ;;  %p659_p11 = scmp.lt.s32.totalorder %s844_s14, %s657_s10 }
  0x23   : > { %p654_p2 = pnand %p652_p0, %p638_p1  ;;  %p660_p4 = scmp.lt.s32.totalorder %s658_s11, %s651_s7 }
  0x25   : > { %p655_p12 = pneg %p654_p2  ;;  %p661_p5 = por %p660_p4, %p659_p11 }
  0x27   : > { %p662_p7 = pnand %p661_p5, %p655_p12 }
  0x29   : > { %665 = shalt.err (!%p662_p7)
}
  0x2a   : > { %s735_s13 = smov 256   ;;  %s736_s17 = smov 16  }
  0x2b   : > { %586 = dma.hbm_to_vmem [thread:$0]  (!%p840_p13), %s836_s12, 512, %s844_s14, %s846_s16, %s735_s13, %s735_s13, %s736_s17  }
  0x2c   : > { %p545_p9 = scmp.ge.s32.totalorder %s732_s21, 1  ;;  %p206_p1 = scmp.lt.s32.totalorder %s732_s21, 3 }
  0x2e   : > { %p207_p3 = pnand %p545_p9, %p206_p1 }
  0x2f   : > { %s877_s23 = sand.u32 (!%p207_p3), 1, %s724_s19  }
  0x30   : > { %210 = sbr.rel (%p207_p3) target bundleno = 804 (0x324), region = 40  ;;  %s546_s25 = sshll.u32 (!%p207_p3), %s877_s23, 5 }
  0x31   : > { %s213_s26 = scalar_lea.sflag (!%p207_p3), [#allocation3], %s877_s23  ;;  %s216_s28 = scalar_lea.vmem (!%p207_p3), [#allocation2], %s546_s25 }
  0x37   : > { %711 = dma.done.wait (%p816_p6), %s213_s26, 512  }
  0x38   : > { %713 = vsyncadd (%p816_p6), %s213_s26, 4294966784  ;;  %v243_v0 = vld [vmem:[%s216_s28] sm:$0xff]  ;;  %v244_v1 = vld [vmem:[%s216_s28 + $0x8] sm:$0xff]  ;;  %v737_v9 = vmov 0.0|0.0   ;;  %vm738_vm0 = vmmov 0   ;;  %v739_v10 = vmov 0.0   ;;  %v260_v11 = vlaneseq }
  0x39   : > { %v887_v2 = vld [vmem:[%s216_s28 + $0x10] sm:$0xff]  ;;  %v247_v3 = vadd.f32 %v244_v1, %v243_v0  ;;  %v889_v4 = vld [vmem:[%s216_s28 + $0x18] sm:$0xff]  ;;  %v255_v6 = vld [vmem:[%s963_s1] sm:$0xff]  ;;  %576 = vmatprep.subr.bf16.mxu0 %v737_v9  ;;  %568 = vmatprep.mubr.msk.f32.mxu0 %vm738_vm0, %v739_v10  ;;  %vm271_vm1 = vcmask 130112   ;;  %vm273_vm2 = vcmask 130048   ;;  %vm353_vm3 = vcmask 1041408  }
  0x3a   : > { %v250_v5 = vadd.f32 %v889_v4, %v887_v2  ;;  %v256_v7 = vld [vmem:[%s963_s1 + $0x8] sm:$0xff]  ;;  %571 = vmatprep.subr.mxu1 %v739_v10  ;;  %573 = vmatprep.mubr.msk.f32.mxu1 %vm738_vm0, %v739_v10  ;;  %v261_v12 = vand.u32 127, %v260_v11  ;;  %v263_v13 = vshrl.u32 %v260_v11, 7  ;;  %v347_v24 = vld [vmem:[%s965_s3] sm:$0x3]  ;;  %vm349_vm4 = vcmask 15360  }
  0x3b   : > { %248 = vadd.xlane.f32.xlu0 %v247_v3  ;;  %v577_v8 = vpack.c.bf16 %v256_v7, %v255_v6  ;;  %572 = vmatpush3.msk.msra.mxu1 %vm353_vm3, %v347_v24  ;;  %v257_v25 = vld [vmem:[%s964_s2] sm:$0x1]  ;;  %s242_s13 = scalar_lea.vmem [#allocation5], %s546_s25  ;;  %s558_s26 = sshll.u32 %s794_s22, 9 }
  0x3c   : > { %v266_v14 = vadd.s32 4294967288, %v261_v12  ;;  %v264_v16 = vsub.s32 %v261_v12, %v263_v13  ;;  %v348_v30 = vld [vmem:[%s966_s4] sm:$0x1]  ;;  %v435_v37 = vsub.s32 0, %v263_v13  ;;  %s466_s17 = sshll.u32 %s242_s13, 4  ;;  %s916_s14 = scalar_lea.hbm %s967_s5, %s558_s26  ;;  %s911_s17 = int_to_ptr.vmem [resolvable:$true] %s466_s17 }
  0x3d   : > { %578 = vmatpush3.bf16.msra.mxu0 %v577_v8  ;;  %s453_s22 = scalar_lea.sflag [#allocation4], %s877_s23  ;;  %s666_s25 = scalar_lea.vmem %s911_s17, 512 }
  0x3e   : > { %v269_v18 = vsub.s32 %v266_v14, %v263_v13  ;;  %p667_p6 = scmp.ne.s32.totalorder %s911_s17, %s666_s25  ;;  %p974_p11 = scmp.ne.s32.totalorder %s971_s30, 0 }
  0x3f   : > { %251 = vadd.xlane.f32.xlu0 %v250_v5  ;;  %s740_s15 = smov [#allocation5]  }
  0x40   : > { %p668_p12 = pnand %p667_p6, %p974_p11  ;;  %s670_s16 = sshll.u32 %s740_s15, 4  ;;  %s671_s16 = int_to_ptr.vmem [resolvable:$false] %s670_s16 }
  0x41   : > { %s672_s29 = scalar_lea.vmem %s671_s16, 1024  ;;  %p673_p8 = scmp.lt.s32.totalorder %s911_s17, %s671_s16 }
  0x42   : > { %p669_p13 = pneg %p668_p12  ;;  %p674_p10 = scmp.lt.s32.totalorder %s672_s29, %s666_s25 }
  0x44   : > { %p675_p0 = por %p674_p10, %p673_p8 }
  0x46   : > { %p676_p2 = pnand %p675_p0, %p669_p13 }
  0xc8   : > { %v249_v15 = vpop.xlane.xlu0 %248 }
  0xc9   : > { %v253_v17 = vmul.f32 0.00390625, %v249_v15 }
  0xcb   : > { %v265_v21 = vrot.slane %v253_v17, %v264_v16 }
  0xcc   : > { %v252_v19 = vpop.xlane.xlu0 %251 }
  0xcd   : > { %v254_v20 = vmul.f32 0.00390625, %v252_v19 }
  0xcf   : > { %v270_v22 = vrot.slane %v254_v20, %v269_v18 }
  0xd1   : > { %v272_v23 = vsel %vm271_vm1, %v270_v22, %v265_v21 }
  0xd2   : > { %569 = vmatmul.mubr.msk.f32.vlgmr.msra.gmra.mrb[0].mxu0 %vm273_vm2, %v272_v23 }
 0x1a5   : > { %v342_v26 = vpop.f32.mrb[0].mxu0 }
 0x1a6   : > { %v343_v27 = vadd.f32 %v342_v26, %v257_v25  ;;  %v570_v28 = vpop.f32.mrb[1].mxu0 }
 0x1a8   : > { %v346_v29 = vmax.f32 %v343_v27, 0.0 }
 0x1aa   : > { %574 = vmatmul.mubr.msk.f32.vlgmr.msra.gmra.mrb[0].mxu1 %vm349_vm4, %v346_v29 }
 0x27d   : > { %v423_v31 = vpop.f32.mrb[0].mxu1 }
 0x27e   : > { %v424_v32 = vadd.f32 %v423_v31, %v348_v30  ;;  %v575_v33 = vpop.f32.mrb[1].mxu1 }
 0x280   : > { %v551_v34 = vmul.f32 -1.442695, %v424_v32 }
 0x282   : > { %632 = vpow2.f32 %v551_v34 }
 0x28c   : > { %v633_v35 = vpop.eup %632 }
 0x28d   : > { %v430_v36 = vadd.f32 1.0, %v633_v35 }
 0x28f   : > { %634 = vrcp.f32 %v430_v36 }
 0x299   : > { %v635_v38 = vpop.eup %634 }
 0x29a   : > { %v436_v39 = vrot.slane %v635_v38, %v435_v37 }
 0x29c   : > { %438 = vbcast.lane.b32.xlu1 %v436_v39, 256 }
 0x2a0   : > { %442 = vbcast.lane.b32.xlu1 %v436_v39, 264 }
 0x30e   : > { %v439_v40 = vpop.permute.xlu1 %438 }
 0x30f   : > { %v444_v41 = vmul.f32 %v439_v40, %v243_v0  ;;  %v445_v42 = vmul.f32 %v439_v40, %v244_v1 }
 0x311   : > { %448 = vst [vmem:[%s242_s13] sm:$0xff] %v444_v41  ;;  %449 = vst [vmem:[%s242_s13 + $0x8] sm:$0xff] %v445_v42 }
 0x312   : > { %v443_v43 = vpop.permute.xlu1 %442 }
 0x313   : > { %v446_v44 = vmul.f32 %v443_v43, %v887_v2  ;;  %v447_v45 = vmul.f32 %v443_v43, %v889_v4 }
 0x315   : > { %450 = vst [vmem:[%s242_s13 + $0x10] sm:$0xff] %v446_v44  ;;  %451 = vst [vmem:[%s242_s13 + $0x18] sm:$0xff] %v447_v45 }
 0x316   : > { %679 = shalt.err (!%p676_p2)
}
 0x317   : > { %s680_s8 = scalar_lea.hbm %s916_s14, 512  ;;  %s684_s10 = scalar_lea.hbm %s967_s5, 1024 }
 0x318   : > { %p681_p4 = scmp.ne.s32.totalorder %s916_s14, %s680_s8  ;;  %p685_p9 = scmp.lt.u32.totalorder %s916_s14, %s967_s5 }
 0x319   : > { %p686_p1 = scmp.lt.u32.totalorder %s684_s10, %s680_s8  ;;  %p688_p6 = scmp.lt.u32.totalorder %s680_s8, %s916_s14 }
 0x31a   : > { %p682_p5 = pnand %p681_p4, %p974_p11 }
 0x31b   : > { %p687_p3 = por %p686_p1, %p685_p9 }
 0x31c   : > { %p683_p7 = pneg %p682_p5 }
 0x31d   : > { %p689_p12 = por %p688_p6, %p687_p3 }
 0x31f   : > { %p690_p13 = pnand %p689_p12, %p683_p7 }
 0x321   : > { %693 = shalt.err (!%p690_p13)
}
 0x322   : > { %s741_s26 = smov 256   ;;  %s742_s28 = smov 16  }
 0x323   : > { %581 = dma.vmem_to_hbm [thread:$0]  (%p974_p11), %s911_s17, 512, %s916_s14, %s453_s22, %s741_s26, %s741_s26, %s742_s28  }
 0x324 PF: > { %s481_s12 = sand.u32 1, %s720_s18   ;;  %p975_p8 = scmp.ne.s32.totalorder %s972_s6, 0 }
 0x325   : > { %p976_p10 = scmp.ge.s32.totalorder %s732_s21, 2  ;;  %s482_s25 = scalar_lea.sflag [#allocation4], %s481_s12 }
 0x327   : > { %p588_p0 = pnand %p976_p10, %p975_p8 }
 0x329   : > { %715 = dma.done.wait (!%p588_p0), %s482_s25, 512  }
 0x32a   : > { %717 = vsyncadd (!%p588_p0), %s482_s25, 4294966784  ;;  %p18_p2 = scmp.ge.s32.totalorder %s798_s24, 4   ;;  %s977_s18 = smov %s724_s19 }
 0x32b   : > { %s978_s19 = smov %s728_s20  ;;  %s979_s20 = smov %s810_s27 }
 0x32c   : > { %s980_s21 = smov %s798_s24  ;;  %20 = sbr.rel (!%p18_p2) target bundleno = 5 (0x5), region = 85 }
 0x333   :  { %487 = vsyncpa [#allocation3], 1 }
 0x334   :  { %489 = vsyncpa [#allocation3 + $0x1], 1 }
 0x335   :  { %490 = vsyncpa [#allocation4], 1 }
 0x336   :  { %492 = vsyncpa [#allocation4 + $0x1], 1 }

</bundles_post_ra>
